<compile_context>
chip_gen: v7x
topology: tpu7x:2x2x1
jax: 0.10.0
libtpu: 0.0.40
codegen_flags: <defaults>
</compile_context>

<pallas_src>
import functools

import jax
import jax.numpy as jnp
from jax.experimental import pallas as pl
from jax.experimental.pallas import tpu as pltpu

_TARGET_TILE_BYTES = 2 * 1024 * 1024  # ~2 MiB of logits per input tile


def _dice_partials_kernel(lg_ref, tg_ref, inter_ref, sump_ref, sumt_ref, *,
                          block_rows, blocks_per_part, valid_rows, mask_tail):
    j = pl.program_id(1)

    # Output blocks keep the same index across the inner ("arbitrary") axis,
    # so they stay resident in VMEM and act as per-part accumulators.
    @pl.when(j == 0)
    def _():
        inter_ref[...] = jnp.zeros_like(inter_ref)
        sump_ref[...] = jnp.zeros_like(sump_ref)
        sumt_ref[...] = jnp.zeros_like(sumt_ref)

    p = jax.nn.sigmoid(lg_ref[...].astype(jnp.float32))
    t = tg_ref[...].astype(jnp.float32)   # targets cast here, not in wrapper

    if mask_tail:
        # Only traced when block_rows does not divide the row count: zero out
        # rows of the (partial) last block that fall past the real data.
        b = pl.program_id(0) * blocks_per_part + j
        row_ids = b * block_rows + jax.lax.broadcasted_iota(
            jnp.int32, (block_rows, 1), 0)
        valid = row_ids < valid_rows
        p = jnp.where(valid, p, 0.0)   # where (not *) so garbage NaN is killed
        t = jnp.where(valid, t, 0.0)

    lanes = p.shape[-1]
    if block_rows % 8 == 0:
        groups = block_rows // 8
        if groups == 1:
            def _acc(ref, x):
                ref[...] += x
        else:
            # Reduce only over the row-group axis; keep (8, lanes) partials.
            # Pure VPU vreg adds per step; the XLU reduce happens once outside.
            def _acc(ref, x):
                ref[...] += jnp.sum(x.reshape(groups, 8, lanes), axis=0)
    else:
        # Tiny-block fallback (block_rows == rows < 8 or odd row counts).
        def _acc(ref, x):
            ref[0:1, :] += jnp.sum(x, axis=0, keepdims=True)

    _acc(inter_ref, p * t)
    _acc(sump_ref, p)
    _acc(sumt_ref, t)


def binary_dice_loss(logits, targets, smooth=1e-8, block_rows=None):
    """logits: (N,1,H,W) float; targets: (N,H,W) binary (any dtype). Scalar."""
    n, c, h, w = logits.shape
    assert c == 1, f"logits should be (N,1,H,W), got {logits.shape}"
    assert targets.shape == (n, h, w), (targets.shape, (n, h, w))

    total = n * h * w

    # Lane-dense 2-D view: widest lane count (multiple of 128) dividing total.
    lanes = None
    for cand in (1024, 512, 256, 128):
        if total % cand == 0:
            lanes = cand
            break

    lg = logits.reshape(-1)
    tg = targets.reshape(-1)          # native dtype preserved; cast in-kernel
    if lanes is None:
        # TODO(synk): rare fallback (total not a multiple of 128) pads the
        # flattened views -> one extra HBM pass. Logits padded with the most
        # negative finite value (sigmoid -> 0), targets with 0, so sums are
        # unchanged.
        lanes = 128
        pad = (-total) % lanes
        neg = jnp.asarray(jnp.finfo(logits.dtype).min, dtype=logits.dtype)
        lg = jnp.concatenate([lg, jnp.full((pad,), neg, dtype=lg.dtype)])
        tg = jnp.concatenate([tg, jnp.zeros((pad,), dtype=tg.dtype)])

    rows = lg.shape[0] // lanes
    lg2d = lg.reshape(rows, lanes)
    tg2d = tg.reshape(rows, lanes)

    # Row-block size: ~2 MiB of logits per tile (amortizes the ~0.35us/step
    # overhead), multiple of 8 sublanes. 2 inputs x 2 buffers stays well under
    # the scoped-VMEM defaults on v5e/v6e/v7x.
    if block_rows is None:
        row_bytes = lanes * logits.dtype.itemsize
        block_rows = max(8, (_TARGET_TILE_BYTES // row_bytes) // 8 * 8)
    if block_rows >= rows:
        block_rows = rows                      # single block covers everything
    else:
        block_rows = max(8, (block_rows // 8) * 8)   # must be a multiple of 8
    nblocks = -(-rows // block_rows)
    mask_tail = (rows % block_rows) != 0

    # Split the row blocks over 2 parts when possible: the leading "parallel"
    # axis lets v7x spread the reduction over both TensorCores.
    num_parts = 2 if (nblocks >= 2 and nblocks % 2 == 0) else 1
    blocks_per_part = nblocks // num_parts

    kernel = functools.partial(
        _dice_partials_kernel,
        block_rows=block_rows,
        blocks_per_part=blocks_per_part,
        valid_rows=rows,
        mask_tail=mask_tail,
    )

    part_shape = jax.ShapeDtypeStruct((num_parts * 8, lanes), jnp.float32)
    part_spec = pl.BlockSpec((8, lanes), lambda p_, j: (p_, 0))
    in_map = lambda p_, j: (p_ * blocks_per_part + j, 0)

    inter_p, sump_p, sumt_p = pl.pallas_call(
        kernel,
        out_shape=(part_shape, part_shape, part_shape),
        grid_spec=pltpu.PrefetchScalarGridSpec(
            num_scalar_prefetch=0,
            grid=(num_parts, blocks_per_part),
            in_specs=[
                pl.BlockSpec((block_rows, lanes), in_map),
                pl.BlockSpec((block_rows, lanes), in_map),
            ],
            out_specs=[part_spec, part_spec, part_spec],
        ),
        compiler_params=pltpu.CompilerParams(
            dimension_semantics=("parallel", "arbitrary"),
            vmem_limit_bytes=32 * 1024 * 1024,
        ),
    )(lg2d, tg2d)

    # Tiny JAX epilogue: one cross-lane/part reduce + the dice ratio.
    intersection = jnp.sum(inter_p)
    union = jnp.sum(sump_p) + jnp.sum(sumt_p)
    dice = (2.0 * intersection + smooth) / (union + smooth)
    return 1.0 - dice


def _reference(logits, targets, smooth=1e-8):
    p = jax.nn.sigmoid(logits.astype(jnp.float32))
    t = targets[:, None, :, :].astype(jnp.float32)
    inter = jnp.sum(p * t)
    union = jnp.sum(p) + jnp.sum(t)
    return 1.0 - (2.0 * inter + smooth) / (union + smooth)


if __name__ == "__main__":
    key = jax.random.PRNGKey(0)
    k1, k2, k3, k4, k5, k6 = jax.random.split(key, 6)

    # Case 1: small shape from the module spec (single lane-dense block).
    N, H, W = 2, 16, 16
    logits = jax.random.normal(k1, (N, 1, H, W), dtype=jnp.float32)
    targets = (jax.random.uniform(k2, (N, H, W)) > 0.5).astype(jnp.float32)
    loss = jax.block_until_ready(binary_dice_loss(logits, targets))
    ref = _reference(logits, targets)
    assert jnp.allclose(loss, ref, atol=2e-4, rtol=2e-4), (loss, ref)

    # Case 2: multi-block grid + 2-part "parallel" axis (small block_rows
    # override so the multi-block path is exercised at a small shape).
    N, H, W = 2, 128, 128
    logits = jax.random.normal(k3, (N, 1, H, W), dtype=jnp.float32)
    targets = (jax.random.uniform(k4, (N, H, W)) > 0.5).astype(jnp.float32)
    loss = jax.block_until_ready(binary_dice_loss(logits, targets, block_rows=8))
    ref = _reference(logits, targets)
    assert jnp.allclose(loss, ref, atol=2e-4, rtol=2e-4), (loss, ref)

    # Case 3: ragged row tail -> in-kernel mask path (no HBM padding copy).
    N, H, W = 2, 88, 64
    logits = jax.random.normal(k5, (N, 1, H, W), dtype=jnp.float32)
    targets = (jax.random.uniform(k6, (N, H, W)) > 0.5).astype(jnp.float32)
    loss = jax.block_until_ready(binary_dice_loss(logits, targets, block_rows=8))
    ref = _reference(logits, targets)
    assert jnp.allclose(loss, ref, atol=2e-4, rtol=2e-4), (loss, ref)

    print("KERNEL_OK")
</pallas_src>

<mosaic_0001>
module attributes {stable_mosaic.version = 11 : i64} {
  func.func @_dice_partials_kernel(%arg0: i32, %arg1: i32, %arg2: memref<1x512xf32, #tpu.memory_space<vmem>>, %arg3: memref<1x512xf32, #tpu.memory_space<vmem>>, %arg4: memref<8x512xf32, #tpu.memory_space<vmem>>, %arg5: memref<8x512xf32, #tpu.memory_space<vmem>>, %arg6: memref<8x512xf32, #tpu.memory_space<vmem>>) attributes {dimension_semantics = [#tpu.dimension_semantics<parallel>, #tpu.dimension_semantics<arbitrary>], iteration_bounds = array<i64: 1, 1>, scalar_prefetch = 0 : i64, scratch_operands = 0 : i64, tpu.core_type = #tpu.core_type<tc>, window_params = [{transform_indices = @transform_0, window_bounds = array<i64: 1, 512>}, {transform_indices = @transform_1, window_bounds = array<i64: 1, 512>}, {transform_indices = @transform_2, window_bounds = array<i64: 8, 512>}, {transform_indices = @transform_3, window_bounds = array<i64: 8, 512>}, {transform_indices = @transform_4, window_bounds = array<i64: 8, 512>}]} {
    %c0_i32 = arith.constant 0 : i32
    %0 = arith.cmpi eq, %arg1, %c0_i32 : i32
    %1 = arith.extui %0 : i1 to i32
    %c0_i32_0 = arith.constant 0 : i32
    %2 = arith.cmpi ne, %1, %c0_i32_0 : i32
    scf.if %2 {
      %cst_19 = arith.constant 0.000000e+00 : f32
      %26 = vector.broadcast %cst_19 : f32 to vector<8x512xf32>
      %c0_20 = arith.constant 0 : index
      %c0_21 = arith.constant 0 : index
      %27 = vector.load %arg4[%c0_20, %c0_21] : memref<8x512xf32, #tpu.memory_space<vmem>>, vector<8x512xf32>
      tpu.vector_store %arg4[%c0_20, %c0_21], %26 {strides = array<i32>} : memref<8x512xf32, #tpu.memory_space<vmem>>, vector<8x512xf32>,
      %cst_22 = arith.constant 0.000000e+00 : f32
      %28 = vector.broadcast %cst_22 : f32 to vector<8x512xf32>
      %c0_23 = arith.constant 0 : index
      %c0_24 = arith.constant 0 : index
      %29 = vector.load %arg5[%c0_23, %c0_24] : memref<8x512xf32, #tpu.memory_space<vmem>>, vector<8x512xf32>
      tpu.vector_store %arg5[%c0_23, %c0_24], %28 {strides = array<i32>} : memref<8x512xf32, #tpu.memory_space<vmem>>, vector<8x512xf32>,
      %cst_25 = arith.constant 0.000000e+00 : f32
      %30 = vector.broadcast %cst_25 : f32 to vector<8x512xf32>
      %c0_26 = arith.constant 0 : index
      %c0_27 = arith.constant 0 : index
      %31 = vector.load %arg6[%c0_26, %c0_27] : memref<8x512xf32, #tpu.memory_space<vmem>>, vector<8x512xf32>
      tpu.vector_store %arg6[%c0_26, %c0_27], %30 {strides = array<i32>} : memref<8x512xf32, #tpu.memory_space<vmem>>, vector<8x512xf32>,
    } else {
    }
    %c0 = arith.constant 0 : index
    %c0_1 = arith.constant 0 : index
    %3 = vector.load %arg2[%c0, %c0_1] : memref<1x512xf32, #tpu.memory_space<vmem>>, vector<1x512xf32>
    %4 = arith.negf %3 : vector<1x512xf32>
    %5 = math.exp %4 : vector<1x512xf32>
    %cst = arith.constant 1.000000e+00 : f32
    %6 = vector.broadcast %cst : f32 to vector<1x512xf32>
    %7 = arith.addf %6, %5 : vector<1x512xf32>
    %8 = arith.divf %6, %7 : vector<1x512xf32>
    %c0_2 = arith.constant 0 : index
    %c0_3 = arith.constant 0 : index
    %9 = vector.load %arg3[%c0_2, %c0_3] : memref<1x512xf32, #tpu.memory_space<vmem>>, vector<1x512xf32>
    %10 = arith.mulf %8, %9 : vector<1x512xf32>
    %c0_4 = arith.constant 0 : index
    %c0_5 = arith.constant 0 : index
    %11 = vector.load %arg4[%c0_4, %c0_5] : memref<8x512xf32, #tpu.memory_space<vmem>>, vector<1x512xf32>
    %cst_6 = arith.constant dense<0.000000e+00> : vector<512xf32>
    %12 = vector.multi_reduction <add>, %10, %cst_6 [0] : vector<1x512xf32> to vector<512xf32>
    %13 = vector.shape_cast %12 : vector<512xf32> to vector<1x512xf32>
    %14 = arith.addf %11, %13 : vector<1x512xf32>
    %c0_7 = arith.constant 0 : index
    %c0_8 = arith.constant 0 : index
    %15 = vector.load %arg4[%c0_7, %c0_8] : memref<8x512xf32, #tpu.memory_space<vmem>>, vector<1x512xf32>
    tpu.vector_store %arg4[%c0_7, %c0_8], %14 {strides = array<i32>} : memref<8x512xf32, #tpu.memory_space<vmem>>, vector<1x512xf32>,
    %c0_9 = arith.constant 0 : index
    %c0_10 = arith.constant 0 : index
    %16 = vector.load %arg5[%c0_9, %c0_10] : memref<8x512xf32, #tpu.memory_space<vmem>>, vector<1x512xf32>
    %cst_11 = arith.constant dense<0.000000e+00> : vector<512xf32>
    %17 = vector.multi_reduction <add>, %8, %cst_11 [0] : vector<1x512xf32> to vector<512xf32>
    %18 = vector.shape_cast %17 : vector<512xf32> to vector<1x512xf32>
    %19 = arith.addf %16, %18 : vector<1x512xf32>
    %c0_12 = arith.constant 0 : index
    %c0_13 = arith.constant 0 : index
    %20 = vector.load %arg5[%c0_12, %c0_13] : memref<8x512xf32, #tpu.memory_space<vmem>>, vector<1x512xf32>
    tpu.vector_store %arg5[%c0_12, %c0_13], %19 {strides = array<i32>} : memref<8x512xf32, #tpu.memory_space<vmem>>, vector<1x512xf32>,
    %c0_14 = arith.constant 0 : index
    %c0_15 = arith.constant 0 : index
    %21 = vector.load %arg6[%c0_14, %c0_15] : memref<8x512xf32, #tpu.memory_space<vmem>>, vector<1x512xf32>
    %cst_16 = arith.constant dense<0.000000e+00> : vector<512xf32>
    %22 = vector.multi_reduction <add>, %9, %cst_16 [0] : vector<1x512xf32> to vector<512xf32>
    %23 = vector.shape_cast %22 : vector<512xf32> to vector<1x512xf32>
    %24 = arith.addf %21, %23 : vector<1x512xf32>
    %c0_17 = arith.constant 0 : index
    %c0_18 = arith.constant 0 : index
    %25 = vector.load %arg6[%c0_17, %c0_18] : memref<8x512xf32, #tpu.memory_space<vmem>>, vector<1x512xf32>
    tpu.vector_store %arg6[%c0_17, %c0_18], %24 {strides = array<i32>} : memref<8x512xf32, #tpu.memory_space<vmem>>, vector<1x512xf32>,
    return
  }
  func.func @transform_0(%arg0: i32, %arg1: i32) -> (i32, i32) {
    %c1_i32 = arith.constant 1 : i32
    %0 = arith.muli %arg0, %c1_i32 : i32
    %1 = arith.addi %0, %arg1 : i32
    %c0_i32 = arith.constant 0 : i32
    %c0_i32_0 = arith.constant 0 : i32
    return %1, %c0_i32 : i32, i32
  }
  func.func @transform_1(%arg0: i32, %arg1: i32) -> (i32, i32) {
    %c1_i32 = arith.constant 1 : i32
    %0 = arith.muli %arg0, %c1_i32 : i32
    %1 = arith.addi %0, %arg1 : i32
    %c0_i32 = arith.constant 0 : i32
    %c0_i32_0 = arith.constant 0 : i32
    return %1, %c0_i32 : i32, i32
  }
  func.func @transform_2(%arg0: i32, %arg1: i32) -> (i32, i32) {
    %c0_i32 = arith.constant 0 : i32
    %c0_i32_0 = arith.constant 0 : i32
    return %arg0, %c0_i32 : i32, i32
  }
  func.func @transform_3(%arg0: i32, %arg1: i32) -> (i32, i32) {
    %c0_i32 = arith.constant 0 : i32
    %c0_i32_0 = arith.constant 0 : i32
    return %arg0, %c0_i32 : i32, i32
  }
  func.func @transform_4(%arg0: i32, %arg1: i32) -> (i32, i32) {
    %c0_i32 = arith.constant 0 : i32
    %c0_i32_0 = arith.constant 0 : i32
    return %arg0, %c0_i32 : i32, i32
  }
}

</mosaic_0001>

<bundles_post_ra>
// kernel: tpu_custom_call.1
= control target key start
LH: loop header
LB: loop body
LE: loop exit
PB: predicated region body
PF: predicated region fallthrough
CT: control target
= control target key end

     0   :  { %10 = vsyncpa [#allocation3], 0  ;;  %s381_s0 = inlined_call_operand.hbm [shape: f32[1,512], index: 0, kind: input, shape index: {}]   ;;  %s382_s1 = inlined_call_operand.hbm [shape: f32[1,512], index: 1, kind: input, shape index: {}]   ;;  %s383_s2 = inlined_call_operand.hbm [shape: f32[8,512], index: 2, kind: output, shape index: {0}]   ;;  %s384_s3 = inlined_call_operand.hbm [shape: f32[8,512], index: 3, kind: output, shape index: {1}]   ;;  %s385_s4 = inlined_call_operand.hbm [shape: f32[8,512], index: 4, kind: output, shape index: {2}]  }
   0x1   :  { %11 = vsyncpa [#allocation6], 0 }
   0x2   :  { %12 = vsyncpa [#allocation4], 0 }
   0x3   :  { %13 = vsyncpa [#allocation9], 0  ;;  %s266_s15 = smov [#allocation2]   ;;  %s267_s17 = smov [#allocation5]  }
   0x4   :  { %s24_s16 = sshll.u32 %s266_s15, 4  ;;  %s38_s18 = sshll.u32 %s267_s17, 4  ;;  %s25_s16 = int_to_ptr.vmem [resolvable:$true] %s24_s16  ;;  %s39_s18 = int_to_ptr.vmem [resolvable:$true] %s38_s18 }
   0x5   :  { %s148_s21 = scalar_lea.hbm %s381_s0, 64 }
   0x6   :  { %p149_p0 = scmp.ne.s32.totalorder %s381_s0, %s148_s21  ;;  %p152_p1 = scmp.lt.u32.totalorder %s148_s21, %s381_s0 }
   0x8   :  { %p154_p2 = pnand %p152_p1, %p149_p0 }
   0xa   :  { %157 = shalt.err (!%p154_p2)
}
   0xb   :  { %s158_s26 = scalar_lea.vmem %s25_s16, 64  ;;  %p163_p4 = scmp.lt.s32.totalorder %s25_s16, %s25_s16 }
   0xc   :  { %p159_p3 = scmp.ne.s32.totalorder %s25_s16, %s158_s26  ;;  %p164_p5 = scmp.lt.s32.totalorder %s158_s26, %s158_s26 }
   0xe   :  { %p165_p6 = por %p164_p5, %p163_p4 }
  0x10   :  { %p166_p7 = pnand %p165_p6, %p159_p3 }
  0x12   :  { %169 = shalt.err (!%p166_p7)
}
  0x13   :  { %27 = dma.hbm_to_vmem [thread:$0]  %s381_s0, 64, %s25_s16, [#allocation3]  }
  0x14   :  { %s170_s5 = scalar_lea.hbm %s382_s1, 64 }
  0x15   :  { %p171_p8 = scmp.ne.s32.totalorder %s382_s1, %s170_s5  ;;  %p174_p9 = scmp.lt.u32.totalorder %s170_s5, %s382_s1 }
  0x17   :  { %p176_p10 = pnand %p174_p9, %p171_p8 }
  0x19   :  { %179 = shalt.err (!%p176_p10)
}
  0x1a   :  { %s180_s10 = scalar_lea.vmem %s39_s18, 64  ;;  %p185_p12 = scmp.lt.s32.totalorder %s39_s18, %s39_s18 }
  0x1b   :  { %p181_p11 = scmp.ne.s32.totalorder %s39_s18, %s180_s10  ;;  %p186_p13 = scmp.lt.s32.totalorder %s180_s10, %s180_s10 }
  0x1d   :  { %p187_p0 = por %p186_p13, %p185_p12 }
  0x1f   :  { %p188_p1 = pnand %p187_p0, %p181_p11 }
  0x21   :  { %191 = shalt.err (!%p188_p1)
}
  0x22   :  { %41 = dma.hbm_to_vmem [thread:$0]  %s382_s1, 64, %s39_s18, [#allocation6]  }
  0x23   :  { %258 = dma.done.wait [#allocation3], 64  }
  0x24   :  { %259 = vsyncadd [#allocation3], 4294967232 }
  0x25   :  { %260 = dma.done.wait [#allocation6], 64  }
  0x26   :  { %261 = vsyncadd [#allocation6], 4294967232  ;;  %v268_v0 = vmov 0.0   ;;  %v78_v1 = vlaneseq  ;;  %v66_v2 = vld [vmem:[#allocation2] sm:$0xf]  ;;  %s269_s1 = smov [#allocation8]  }
  0x27   :  { %58 = vst [vmem:[#allocation8] sm:$0xff] %v268_v0  ;;  %54 = vst [vmem:[#allocation7] sm:$0xff] %v268_v0  ;;  %v137_v3 = vmul.f32 -1.442695, %v66_v2  ;;  %v73_v5 = vld [vmem:[#allocation5] sm:$0xf] }
  0x28   :  { %55 = vst [vmem:[#allocation7 + $0x8] sm:$0xff] %v268_v0  ;;  %56 = vst [vmem:[#allocation7 + $0x10] sm:$0xff] %v268_v0  ;;  %vm321_vm0 = vcmp.lt.s32.totalorder %v78_v1, 512  ;;  %s110_s12 = sshll.u32 %s269_s1, 4  ;;  %s270_s13 = smov [#allocation10]   ;;  %s111_s12 = int_to_ptr.vmem [resolvable:$true] %s110_s12 }
  0x29   :  { %57 = vst [vmem:[#allocation7 + $0x18] sm:$0xff] %v268_v0  ;;  %59 = vst [vmem:[#allocation8 + $0x8] sm:$0xff] %v268_v0  ;;  %144 = vpow2.f32 %v137_v3  ;;  %s120_s14 = sshll.u32 %s270_s13, 4  ;;  %s271_s15 = smov [#allocation7]   ;;  %s327_s14 = int_to_ptr.vmem [resolvable:$true] %s120_s14 }
  0x2a   :  { %60 = vst [vmem:[#allocation8 + $0x10] sm:$0xff] %v268_v0  ;;  %61 = vst [vmem:[#allocation8 + $0x18] sm:$0xff] %v268_v0  ;;  %s100_s16 = sshll.u32 %s271_s15, 4  ;;  %s192_s17 = scalar_lea.vmem %s111_s12, 512  ;;  %s331_s16 = int_to_ptr.vmem [resolvable:$true] %s100_s16 }
  0x2b   :  { %62 = vst [vmem:[#allocation10] sm:$0xff] %v268_v0  ;;  %63 = vst [vmem:[#allocation10 + $0x8] sm:$0xff] %v268_v0  ;;  %p193_p2 = scmp.ne.s32.totalorder %s111_s12, %s192_s17  ;;  %p197_p3 = scmp.lt.s32.totalorder %s111_s12, %s111_s12 }
  0x2c   :  { %64 = vst [vmem:[#allocation10 + $0x10] sm:$0xff] %v268_v0  ;;  %65 = vst [vmem:[#allocation10 + $0x18] sm:$0xff] %v268_v0  ;;  %p198_p4 = scmp.lt.s32.totalorder %s192_s17, %s192_s17 }
  0x2e   :  { %p199_p5 = por %p198_p4, %p197_p3 }
  0x30   :  { %v75_v12 = vld [vmem:[#allocation7] ss:$8 sm:$0xf]  ;;  %p200_p6 = pnand %p199_p5, %p193_p2 }
  0x31   :  { %v84_v10 = vld [vmem:[#allocation8] ss:$8 sm:$0xf] }
  0x33   :  { %v89_v6 = vld [vmem:[#allocation10] ss:$8 sm:$0xf]  ;;  %v145_v8 = vpop.eup %144 }
  0x34   :  { %v91_v7 = vadd.f32 %v89_v6, %v73_v5  ;;  %v70_v9 = vadd.f32 1.0, %v145_v8 }
  0x36   :  { %92 = vst.msk [vmem:[#allocation10] ss:$8 sm:$0xf] %vm321_vm0, %v91_v7  ;;  %146 = vrcp.f32 %v70_v9 }
  0x40   :  { %v147_v11 = vpop.eup %146 }
  0x41   :  { %v86_v13 = vadd.f32 %v147_v11, %v84_v10  ;;  %v74_v14 = vmul.f32 %v147_v11, %v73_v5 }
  0x43   :  { %87 = vst.msk [vmem:[#allocation8] ss:$8 sm:$0xf] %vm321_vm0, %v86_v13  ;;  %v77_v15 = vadd.f32 %v75_v12, %v74_v14 }
  0x44   :  { %203 = shalt.err (!%p200_p6)
}
  0x45   :  { %s204_s20 = scalar_lea.hbm %s384_s3, 512 }
  0x46   :  { %p205_p7 = scmp.ne.s32.totalorder %s384_s3, %s204_s20  ;;  %p208_p8 = scmp.lt.u32.totalorder %s204_s20, %s384_s3 }
  0x48   :  { %p210_p9 = pnand %p208_p8, %p205_p7 }
  0x4a   :  { %213 = shalt.err (!%p210_p9)
}
  0x4b   :  { %113 = dma.vmem_to_hbm [thread:$0]  %s111_s12, 512, %s384_s3, [#allocation9]   ;;  %82 = vst.msk [vmem:[#allocation7] ss:$8 sm:$0xf] %vm321_vm0, %v77_v15 }
  0x4c   :  { %s214_s27 = scalar_lea.vmem %s327_s14, 512  ;;  %p219_p11 = scmp.lt.s32.totalorder %s327_s14, %s327_s14 }
  0x4d   :  { %p215_p10 = scmp.ne.s32.totalorder %s327_s14, %s214_s27  ;;  %p220_p12 = scmp.lt.s32.totalorder %s214_s27, %s214_s27 }
  0x4f   :  { %p221_p13 = por %p220_p12, %p219_p11 }
  0x51   :  { %p222_p0 = pnand %p221_p13, %p215_p10 }
  0x53   :  { %225 = shalt.err (!%p222_p0)
}
  0x54   :  { %s226_s30 = scalar_lea.hbm %s385_s4, 512 }
  0x55   :  { %p227_p1 = scmp.ne.s32.totalorder %s385_s4, %s226_s30  ;;  %p230_p2 = scmp.lt.u32.totalorder %s226_s30, %s385_s4 }
  0x57   :  { %p232_p3 = pnand %p230_p2, %p227_p1 }
  0x59   :  { %235 = shalt.err (!%p232_p3)
}
  0x5a   :  { %123 = dma.vmem_to_hbm [thread:$0]  %s327_s14, 512, %s385_s4, [#allocation9]  }
  0x5b   :  { %s236_s10 = scalar_lea.vmem %s331_s16, 512  ;;  %p241_p5 = scmp.lt.s32.totalorder %s331_s16, %s331_s16 }
  0x5c   :  { %p237_p4 = scmp.ne.s32.totalorder %s331_s16, %s236_s10  ;;  %p242_p6 = scmp.lt.s32.totalorder %s236_s10, %s236_s10 }
  0x5e   :  { %p243_p7 = por %p242_p6, %p241_p5 }
  0x60   :  { %p244_p8 = pnand %p243_p7, %p237_p4 }
  0x62   :  { %247 = shalt.err (!%p244_p8)
}
  0x63   :  { %s248_s1 = scalar_lea.hbm %s383_s2, 512 }
  0x64   :  { %p249_p9 = scmp.ne.s32.totalorder %s383_s2, %s248_s1  ;;  %p252_p10 = scmp.lt.u32.totalorder %s248_s1, %s383_s2 }
  0x66   :  { %p254_p11 = pnand %p252_p10, %p249_p9 }
  0x68   :  { %257 = shalt.err (!%p254_p11)
}
  0x69   :  { %103 = dma.vmem_to_hbm [thread:$0]  %s331_s16, 512, %s383_s2, [#allocation4]  }
  0x6a   :  { %262 = dma.done.wait [#allocation4], 512  }
  0x6b   :  { %263 = vsyncadd [#allocation4], 4294966784 }
  0x6c   :  { %264 = dma.done.wait [#allocation9], 1024  }
  0x6d   :  { %265 = vsyncadd [#allocation9], 4294966272 }
  0x6e   :  { %133 = vsyncpa [#allocation3], 1 }
  0x6f   :  { %134 = vsyncpa [#allocation6], 1 }
  0x70   :  { %135 = vsyncpa [#allocation4], 1 }
  0x71   :  { %136 = vsyncpa [#allocation9], 1 }

</bundles_post_ra>
